<compile_context>
chip_gen: v5e
topology: v5e:2x2
jax: 0.10.0
libtpu: 0.0.40
codegen_flags: <defaults>
</compile_context>

<pallas_src>
import math

import jax
import jax.numpy as jnp
from jax.experimental import pallas as pl
from jax.experimental.pallas import tpu as pltpu


def coxph_kernel(x_ref, w_ref, b_ref, o_ref):
    # Hot path: (TILE_N, F) @ (F, 1) on the MXU, f32 accumulation, scalar bias add.
    x = x_ref[...]                                                  # (TILE_N, F) native dtype
    w = w_ref[...]                                                  # (F, 1)       same dtype
    logits = jnp.dot(x, w, preferred_element_type=jnp.float32)     # (TILE_N, 1) f32
    o_ref[...] = (logits + b_ref[0, 0]).astype(o_ref.dtype)


def _choose_tile_rows(n: int, f: int, itemsize: int,
                      per_buffer_bytes: int = 4 * 1024 * 1024,
                      max_rows: int = 1024) -> int:
    """Biggest 8-row-aligned tile <= max_rows whose per-buffer footprint stays small
    enough that 2x double-buffering fits the default scoped VMEM on v5e/v6e/v7x."""
    rows = per_buffer_bytes // max(1, f * itemsize)
    rows = min(max_rows, rows)
    rows = max(8, (rows // 8) * 8)          # (8, 128) sublane alignment on 2nd-to-last dim
    if rows >= n:
        return n                            # single block == full array dims (always legal)
    return rows


def coxph_forward(x: jax.Array, weight: jax.Array, bias: jax.Array,
                  *, tile_rows: int | None = None) -> jax.Array:
    """CoxPH.forward: returns x @ weight + bias with shape (batch, 1), f32 logits."""
    n, f = x.shape
    assert weight.shape == (f, 1)
    w = weight.astype(x.dtype)                            # tiny; match streaming dtype
    bias_2d = jnp.asarray(bias, jnp.float32).reshape(1, 1)

    itemsize = jnp.dtype(x.dtype).itemsize
    if tile_rows is None:
        tile_rows = _choose_tile_rows(n, f, itemsize)
    grid = (pl.cdiv(n, tile_rows),)

    cost = pl.CostEstimate(
        flops=2 * n * f,
        transcendentals=0,
        bytes_accessed=n * f * itemsize + f * itemsize + n * 4,
    )

    return pl.pallas_call(
        coxph_kernel,
        out_shape=jax.ShapeDtypeStruct((n, 1), jnp.float32),
        grid=grid,
        in_specs=[
            pl.BlockSpec((tile_rows, f), lambda i: (i, 0)),   # x: stream batch tiles
            pl.BlockSpec((f, 1), lambda i: (0, 0)),           # weight: resident block
            pl.BlockSpec(memory_space=pltpu.SMEM),            # bias: scalar in SMEM
        ],
        out_specs=pl.BlockSpec((tile_rows, 1), lambda i: (i, 0)),
        compiler_params=pltpu.CompilerParams(
            dimension_semantics=("parallel",),                # batch axis is independent
        ),
        cost_estimate=cost,
    )(x, w, bias_2d)


def init_coxph_params(key: jax.Array, in_features: int):
    """Deterministic init mirroring torch.nn.Linear defaults (U(-1/sqrt(F), 1/sqrt(F)))."""
    k_w, k_b = jax.random.split(key)
    bound = 1.0 / math.sqrt(in_features)
    weight = jax.random.uniform(
        k_w, (in_features, 1), dtype=jnp.float32, minval=-bound, maxval=bound
    )
    bias = jax.random.uniform(
        k_b, (1,), dtype=jnp.float32, minval=-bound, maxval=bound
    )
    return weight, bias


# TODO(synk): baseline_hazard / calculate_baseline_survival (Breslow estimator with
# data-dependent argsort and a variable-length Python loop) is fitting-time glue,
# not part of forward(); it is left out of the kernel.

if __name__ == "__main__":
    key = jax.random.PRNGKey(0)
    k_x, k_params, k_x2 = jax.random.split(key, 3)

    # Small shape consistent with the module's forward().
    batch, in_features = 16, 32
    x = jax.random.normal(k_x, (batch, in_features), dtype=jnp.float32)
    weight, bias = init_coxph_params(k_params, in_features)

    out = coxph_forward(x, weight, bias)
    out = jax.block_until_ready(out)
    ref = x @ weight + bias.reshape(1, 1)
    assert out.shape == (batch, 1)
    assert jnp.allclose(out, ref, atol=1e-5, rtol=1e-5), "mismatch vs reference (small)"

    # Second check exercising a multi-step grid with a ragged final tile.
    n2, f2 = 2050, 64
    x2 = jax.random.normal(k_x2, (n2, f2), dtype=jnp.float32)
    w2, b2 = init_coxph_params(jax.random.PRNGKey(1), f2)
    out2 = jax.block_until_ready(coxph_forward(x2, w2, b2))
    ref2 = x2 @ w2 + b2.reshape(1, 1)
    assert out2.shape == (n2, 1)
    assert jnp.allclose(out2, ref2, atol=1e-4, rtol=1e-5), "mismatch vs reference (tiled)"

    print("KERNEL_OK")
</pallas_src>

<mosaic_0001>
module attributes {stable_mosaic.version = 11 : i64} {
  func.func @coxph_kernel(%arg0: i32, %arg1: memref<16x32xf32, #tpu.memory_space<vmem>>, %arg2: memref<32x1xf32, #tpu.memory_space<vmem>>, %arg3: memref<1x1xf32, #tpu.memory_space<smem>>, %arg4: memref<16x1xf32, #tpu.memory_space<vmem>>) attributes {dimension_semantics = [#tpu.dimension_semantics<parallel>], iteration_bounds = array<i64: 1>, scalar_prefetch = 0 : i64, scratch_operands = 0 : i64, tpu.core_type = #tpu.core_type<tc>, window_params = [{transform_indices = @transform_0, window_bounds = array<i64: 16, 32>}, {pipeline_mode = #tpu.pipeline_mode<synchronous>, transform_indices = @transform_1, window_bounds = array<i64: 32, 1>}, {transform_indices = @transform_2, window_bounds = array<i64: 1, 1>}, {transform_indices = @transform_3, window_bounds = array<i64: 16, 1>}]} {
    %c0 = arith.constant 0 : index
    %c0_0 = arith.constant 0 : index
    %0 = vector.load %arg1[%c0, %c0_0] : memref<16x32xf32, #tpu.memory_space<vmem>>, vector<16x32xf32>
    %c0_1 = arith.constant 0 : index
    %c0_2 = arith.constant 0 : index
    %1 = vector.load %arg2[%c0_1, %c0_2] : memref<32x1xf32, #tpu.memory_space<vmem>>, vector<32x1xf32>
    %cst = arith.constant dense<0.000000e+00> : vector<16x1xf32>
    %2 = tpu.matmul %0, %1, %cst {dimension_numbers = #tpu.dot_dimension_numbers<[1], [0], [0], [1], [0, 0, 1, 1], [], []>} : vector<16x32xf32>, vector<32x1xf32>, vector<16x1xf32> -> vector<16x1xf32>
    %c0_3 = arith.constant 0 : index
    %c0_4 = arith.constant 0 : index
    %3 = memref.load %arg3[%c0_3, %c0_4] : memref<1x1xf32, #tpu.memory_space<smem>>
    %4 = vector.broadcast %3 : f32 to vector<16x1xf32>
    %5 = arith.addf %2, %4 : vector<16x1xf32>
    %c0_5 = arith.constant 0 : index
    %c0_6 = arith.constant 0 : index
    %6 = vector.load %arg4[%c0_5, %c0_6] : memref<16x1xf32, #tpu.memory_space<vmem>>, vector<16x1xf32>
    tpu.vector_store %arg4[%c0_5, %c0_6], %5 {strides = array<i32>} : memref<16x1xf32, #tpu.memory_space<vmem>>, vector<16x1xf32>,
    return
  }
  func.func @transform_0(%arg0: i32) -> (i32, i32) {
    %c0_i32 = arith.constant 0 : i32
    %c0_i32_0 = arith.constant 0 : i32
    return %arg0, %c0_i32 : i32, i32
  }
  func.func @transform_1(%arg0: i32) -> (i32, i32) {
    %c0_i32 = arith.constant 0 : i32
    %c0_i32_0 = arith.constant 0 : i32
    %c0_i32_1 = arith.constant 0 : i32
    return %c0_i32, %c0_i32_0 : i32, i32
  }
  func.func @transform_2(%arg0: i32) -> (i32, i32) {
    %c0_i32 = arith.constant 0 : i32
    %c0_i32_0 = arith.constant 0 : i32
    %c0_i32_1 = arith.constant 0 : i32
    return %c0_i32, %c0_i32_0 : i32, i32
  }
  func.func @transform_3(%arg0: i32) -> (i32, i32) {
    %c0_i32 = arith.constant 0 : i32
    %c0_i32_0 = arith.constant 0 : i32
    return %arg0, %c0_i32 : i32, i32
  }
}

</mosaic_0001>

<bundles_post_ra>
// kernel: tpu_custom_call.1
= control target key start
LH: loop header
LB: loop body
LE: loop exit
PB: predicated region body
PF: predicated region fallthrough
CT: control target
= control target key end

     0   :  { %vm23_vm0 = vcmask 261120   ;;  %vm53_vm1 = vcmask 7168   ;;  %s113_s1 = inlined_call_operand.vmem [shape: f32[32,1], index: 1, kind: input, shape index: {}]   ;;  %s114_s0 = inlined_call_operand.vmem [shape: f32[16,32], index: 0, kind: input, shape index: {}]   ;;  %s115_s2 = inlined_call_operand.<no memory space> [shape: f32[1,1], index: 2, kind: input, shape index: {}]   ;;  %s116_s3 = inlined_call_operand.vmem [shape: f32[16,1], index: 3, kind: output, shape index: {}]  }
   0x1   :  { %v20_v0 = vld [vmem:[%s113_s1 + $0x18] sm:$0xff]  ;;  %v19_v1 = vld [vmem:[%s113_s1 + $0x10] sm:$0xff]  ;;  %v18_v2 = vld [vmem:[%s113_s1 + $0x8] sm:$0xff]  ;;  %v22_v6 = vstv %s115_s2 }
   0x2   :  { %42 = vmatpush.msra.mxu0 %v20_v0  ;;  %62 = vmatpush.msra.mxu1 %v20_v0  ;;  %v17_v3 = vld [vmem:[%s113_s1] sm:$0xff]  ;;  %v16_v5 = vld [vmem:[%s114_s0 + $0x8] sm:$0xff] }
   0x3   :  { %v15_v4 = vld [vmem:[%s114_s0] sm:$0xff] }
   0x4   :  { %43 = vmatpush.msra.mxu0 %v19_v1  ;;  %63 = vmatpush.msra.mxu1 %v19_v1 }
   0x6   :  { %44 = vmatpush.msra.mxu0 %v18_v2  ;;  %64 = vmatpush.msra.mxu1 %v18_v2 }
   0x8   :  { %45 = vmatpush.msra.mxu0 %v17_v3  ;;  %65 = vmatpush.msra.mxu1 %v17_v3 }
   0x9   :  { %60 = vmatmul.msk.f32.vlgmr.msra.gmra.mxu0 %vm23_vm0, %v15_v4  ;;  %61 = vmatmul.msk.f32.vlgmr.msra.gmra.mxu1 %vm23_vm0, %v16_v5 }
  0x86   :  { %v47_v7 = vpop.f32.mrf.mxu0  ;;  %v50_v8 = vpop.f32.mrf.mxu1 }
  0x87   :  { %v48_v9 = vadd.f32 %v47_v7, %v22_v6  ;;  %v51_v10 = vadd.f32 %v50_v8, %v22_v6 }
  0x89   :  { %54 = vst.msk [vmem:[%s116_s3] sm:$0xff] %vm53_vm1, %v48_v9 }
  0x8a   :  { %55 = vst.msk [vmem:[%s116_s3 + $0x8] sm:$0xff] %vm53_vm1, %v51_v10 }

</bundles_post_ra>
